<compile_context>
chip_gen: v7x
topology: tpu7x:2x2x1
jax: 0.10.0
libtpu: 0.0.40
codegen_flags: <defaults>
</compile_context>

<pallas_src>
import jax
import jax.numpy as jnp
from jax.experimental import pallas as pl
from jax.experimental.pallas import tpu as pltpu

IN_FEATURES = 28 * 28          # 784 (kept unpadded in HBM / at the kernel boundary)
_SUBLANE = 16                  # bf16 input packing -> keep batch tiles multiples of 16

# Real (in, out) per Linear layer, and the shapes actually stored / fed to the MXU.
# Only the narrow latent layers are zero-padded to a lane-dense 128 (intermediates are
# VMEM-only, so this is free while HBM-bound); the 784-wide ends stay unpadded.
_LAYER_DIMS = [(784, 128), (128, 64), (64, 32), (32, 64), (64, 128), (128, 784)]
_LAYER_PAD  = [(784, 128), (128, 128), (128, 128), (128, 128), (128, 128), (128, 784)]


def _autoencoder_kernel(x_ref,
                        w1, b1, w2, b2, w3, b3,      # encoder (bf16 weights, f32 biases)
                        w4, b4, w5, b5, w6, b6,      # decoder
                        o_ref):
    def dense(h, w_ref, b_ref):
        # bf16 x bf16 MXU matmul with f32 accumulation; bias/activation stay f32.
        return jnp.dot(h.astype(jnp.bfloat16), w_ref[...],
                       preferred_element_type=jnp.float32) + b_ref[...]

    h = x_ref[...]                                   # (TILE_B, 784) bf16
    # ---- encoder ---- (zero-padded weight rows/cols + ReLU(0)=0 keep padded lanes == 0)
    h = jnp.maximum(dense(h, w1, b1), 0.0)           # (TILE_B, 128)
    h = jnp.maximum(dense(h, w2, b2), 0.0)           # (TILE_B, 128), lanes 64..127 == 0
    h = jnp.maximum(dense(h, w3, b3), 0.0)           # (TILE_B, 128), lanes 32..127 == 0
    # ---- decoder ----
    h = jnp.maximum(dense(h, w4, b4), 0.0)           # (TILE_B, 128)
    h = jnp.maximum(dense(h, w5, b5), 0.0)           # (TILE_B, 128)
    # Single lane-dense store of the real 784 columns (f32, masked only in the last vreg).
    o_ref[...] = jax.nn.sigmoid(dense(h, w6, b6))    # (TILE_B, 784)


def _cdiv(a, b):
    return -(-a // b)


def _round_up(x, m):
    return _cdiv(x, m) * m


def _choose_tiling(batch, tile_cap=512):
    """Batch tiling with minimal padding; prefer >=2 grid steps (v7x 2-TC sharding)."""
    n_tiles = max(_cdiv(batch, tile_cap), 1)
    if n_tiles == 1 and batch > 2 * _SUBLANE:
        n_tiles = 2                                   # let the parallel axis use both TCs
    tile_b = _round_up(_cdiv(batch, n_tiles), _SUBLANE)
    return tile_b, tile_b * n_tiles


def pack_params(params):
    """Zero-pad latent layers to lane-dense shapes; weights -> bf16, biases -> f32 (1, out)."""
    flat = []
    for (w, b), (in_p, out_p) in zip(params, _LAYER_PAD):
        fi, fo = w.shape
        w_p = jnp.zeros((in_p, out_p), jnp.float32).at[:fi, :fo].set(w)
        b_p = jnp.zeros((1, out_p), jnp.float32).at[0, :fo].set(b)
        flat.append(w_p.astype(jnp.bfloat16))
        flat.append(b_p)
    return flat


def autoencoder_forward(x_nchw, params, *, tile_b=512):
    """x_nchw: (B, 1, 28, 28) f32. Returns (B, 784) f32 (same semantics as PyTorch forward)."""
    B = x_nchw.shape[0]
    # bf16 at the boundary: first matmul consumed bf16 anyway; halves input HBM bytes.
    x_flat = x_nchw.reshape(B, -1).astype(jnp.bfloat16)                 # (B, 784)

    TILE_B, B_pad = _choose_tiling(B, tile_b)
    x_pad = jnp.pad(x_flat, ((0, B_pad - B), (0, 0)))                   # row padding only

    flat_params = pack_params(params)

    io_spec = pl.BlockSpec((TILE_B, IN_FEATURES), lambda i: (i, 0))
    # Full-array blocks with a constant index_map -> weights DMA'd once, VMEM-resident
    # across all grid steps (~0.5 MiB bf16 total, so default buffering is harmless).
    param_specs = [pl.BlockSpec(p.shape, lambda i: (0, 0)) for p in flat_params]

    n_mac = sum(fi * fo for fi, fo in _LAYER_DIMS)
    weight_bytes = sum(int(p.size) * p.dtype.itemsize for p in flat_params)
    cost = pl.CostEstimate(
        flops=2 * B_pad * n_mac,
        transcendentals=B_pad * IN_FEATURES,                            # sigmoid
        bytes_accessed=B_pad * IN_FEATURES * (2 + 4) + weight_bytes,    # bf16 in, f32 out
    )

    # Double-buffered I/O tiles + (double-buffered, tiny) weights + headroom,
    # capped at 48 MiB so a larger TILE_B can never blow v7x's 64 MiB per-TC VMEM.
    tile_io_bytes = TILE_B * IN_FEATURES * (2 + 4)
    vmem_limit = min(2 * tile_io_bytes + 2 * weight_bytes + (8 << 20), 48 << 20)

    out = pl.pallas_call(
        _autoencoder_kernel,
        out_shape=jax.ShapeDtypeStruct((B_pad, IN_FEATURES), jnp.float32),
        grid=(B_pad // TILE_B,),
        in_specs=[io_spec] + param_specs,
        out_specs=io_spec,
        compiler_params=pltpu.CompilerParams(
            dimension_semantics=("parallel",),          # megacore sharding on v7x
            vmem_limit_bytes=int(vmem_limit),
        ),
        cost_estimate=cost,
    )(x_pad, *flat_params)

    return out[:B]                                      # drop padded batch rows only


def init_params(key):
    """Deterministic init matching nn.Linear shapes (stored transposed: (in, out))."""
    params = []
    for (fan_in, fan_out) in _LAYER_DIMS:
        key, kw, kb = jax.random.split(key, 3)
        bound = 1.0 / jnp.sqrt(jnp.float32(fan_in))
        w = jax.random.uniform(kw, (fan_in, fan_out), jnp.float32, -bound, bound)
        b = jax.random.uniform(kb, (fan_out,), jnp.float32, -bound, bound)
        params.append((w, b))
    return params


def _reference_forward(x_nchw, params):
    """Pure-JAX reference using the same bf16 weights / f32 accumulation."""
    B = x_nchw.shape[0]
    h = x_nchw.reshape(B, -1).astype(jnp.float32)
    acts = [jax.nn.relu] * 5 + [jax.nn.sigmoid]
    for (w, b), act in zip(params, acts):
        h = act(jnp.dot(h.astype(jnp.bfloat16), w.astype(jnp.bfloat16),
                        preferred_element_type=jnp.float32) + b.astype(jnp.float32))
    return h


if __name__ == "__main__":
    key = jax.random.PRNGKey(0)
    key, kx = jax.random.split(key)

    # Small Fashion-MNIST-like batch: NCHW (B=2, C=1, H=28, W=28)
    x = jax.random.uniform(kx, (2, 1, 28, 28), jnp.float32)
    params = init_params(key)

    y = autoencoder_forward(x, params)
    jax.block_until_ready(y)

    assert y.shape == (2, 28 * 28)
    assert y.dtype == jnp.float32
    # Sigmoid output must lie in [0, 1]
    assert bool(jnp.all((y >= 0.0) & (y <= 1.0)))
    # Numerical check vs pure-JAX reference (same bf16 weights, f32 accumulation).
    y_ref = _reference_forward(x, params)
    assert bool(jnp.all(jnp.abs(y - y_ref) < 2e-2))

    print("KERNEL_OK")
</pallas_src>

<mosaic_0001>
module attributes {stable_mosaic.version = 11 : i64} {
  func.func @_autoencoder_kernel(%arg0: i32, %arg1: memref<16x784xbf16, #tpu.memory_space<vmem>>, %arg2: memref<784x128xbf16, #tpu.memory_space<vmem>>, %arg3: memref<1x128xf32, #tpu.memory_space<vmem>>, %arg4: memref<128x128xbf16, #tpu.memory_space<vmem>>, %arg5: memref<1x128xf32, #tpu.memory_space<vmem>>, %arg6: memref<128x128xbf16, #tpu.memory_space<vmem>>, %arg7: memref<1x128xf32, #tpu.memory_space<vmem>>, %arg8: memref<128x128xbf16, #tpu.memory_space<vmem>>, %arg9: memref<1x128xf32, #tpu.memory_space<vmem>>, %arg10: memref<128x128xbf16, #tpu.memory_space<vmem>>, %arg11: memref<1x128xf32, #tpu.memory_space<vmem>>, %arg12: memref<128x784xbf16, #tpu.memory_space<vmem>>, %arg13: memref<1x784xf32, #tpu.memory_space<vmem>>, %arg14: memref<16x784xf32, #tpu.memory_space<vmem>>) attributes {dimension_semantics = [#tpu.dimension_semantics<parallel>], iteration_bounds = array<i64: 1>, scalar_prefetch = 0 : i64, scratch_operands = 0 : i64, tpu.core_type = #tpu.core_type<tc>, window_params = [{transform_indices = @transform_0, window_bounds = array<i64: 16, 784>}, {pipeline_mode = #tpu.pipeline_mode<synchronous>, transform_indices = @transform_1, window_bounds = array<i64: 784, 128>}, {pipeline_mode = #tpu.pipeline_mode<synchronous>, transform_indices = @transform_2, window_bounds = array<i64: 1, 128>}, {pipeline_mode = #tpu.pipeline_mode<synchronous>, transform_indices = @transform_3, window_bounds = array<i64: 128, 128>}, {pipeline_mode = #tpu.pipeline_mode<synchronous>, transform_indices = @transform_4, window_bounds = array<i64: 1, 128>}, {pipeline_mode = #tpu.pipeline_mode<synchronous>, transform_indices = @transform_5, window_bounds = array<i64: 128, 128>}, {pipeline_mode = #tpu.pipeline_mode<synchronous>, transform_indices = @transform_6, window_bounds = array<i64: 1, 128>}, {pipeline_mode = #tpu.pipeline_mode<synchronous>, transform_indices = @transform_7, window_bounds = array<i64: 128, 128>}, {pipeline_mode = #tpu.pipeline_mode<synchronous>, transform_indices = @transform_8, window_bounds = array<i64: 1, 128>}, {pipeline_mode = #tpu.pipeline_mode<synchronous>, transform_indices = @transform_9, window_bounds = array<i64: 128, 128>}, {pipeline_mode = #tpu.pipeline_mode<synchronous>, transform_indices = @transform_10, window_bounds = array<i64: 1, 128>}, {pipeline_mode = #tpu.pipeline_mode<synchronous>, transform_indices = @transform_11, window_bounds = array<i64: 128, 784>}, {pipeline_mode = #tpu.pipeline_mode<synchronous>, transform_indices = @transform_12, window_bounds = array<i64: 1, 784>}, {transform_indices = @transform_13, window_bounds = array<i64: 16, 784>}]} {
    %c0 = arith.constant 0 : index
    %c0_0 = arith.constant 0 : index
    %0 = vector.load %arg1[%c0, %c0_0] : memref<16x784xbf16, #tpu.memory_space<vmem>>, vector<16x784xbf16>
    %c0_1 = arith.constant 0 : index
    %c0_2 = arith.constant 0 : index
    %1 = vector.load %arg2[%c0_1, %c0_2] : memref<784x128xbf16, #tpu.memory_space<vmem>>, vector<784x128xbf16>
    %cst = arith.constant dense<0.000000e+00> : vector<16x128xf32>
    %2 = tpu.matmul %0, %1, %cst {dimension_numbers = #tpu.dot_dimension_numbers<[1], [0], [0], [1], [0, 0, 1, 1], [], []>} : vector<16x784xbf16>, vector<784x128xbf16>, vector<16x128xf32> -> vector<16x128xf32>
    %c0_3 = arith.constant 0 : index
    %c0_4 = arith.constant 0 : index
    %3 = vector.load %arg3[%c0_3, %c0_4] : memref<1x128xf32, #tpu.memory_space<vmem>>, vector<1x128xf32>
    %4 = vector.broadcast %3 : vector<1x128xf32> to vector<16x128xf32>
    %5 = arith.addf %2, %4 : vector<16x128xf32>
    %cst_5 = arith.constant 0.000000e+00 : f32
    %6 = vector.broadcast %cst_5 : f32 to vector<16x128xf32>
    %7 = arith.maximumf %5, %6 : vector<16x128xf32>
    %8 = arith.truncf %7 : vector<16x128xf32> to vector<16x128xbf16>
    %c0_6 = arith.constant 0 : index
    %c0_7 = arith.constant 0 : index
    %9 = vector.load %arg4[%c0_6, %c0_7] : memref<128x128xbf16, #tpu.memory_space<vmem>>, vector<128x128xbf16>
    %cst_8 = arith.constant dense<0.000000e+00> : vector<16x128xf32>
    %10 = tpu.matmul %8, %9, %cst_8 {dimension_numbers = #tpu.dot_dimension_numbers<[1], [0], [0], [1], [0, 0, 1, 1], [], []>} : vector<16x128xbf16>, vector<128x128xbf16>, vector<16x128xf32> -> vector<16x128xf32>
    %c0_9 = arith.constant 0 : index
    %c0_10 = arith.constant 0 : index
    %11 = vector.load %arg5[%c0_9, %c0_10] : memref<1x128xf32, #tpu.memory_space<vmem>>, vector<1x128xf32>
    %12 = vector.broadcast %11 : vector<1x128xf32> to vector<16x128xf32>
    %13 = arith.addf %10, %12 : vector<16x128xf32>
    %cst_11 = arith.constant 0.000000e+00 : f32
    %14 = vector.broadcast %cst_11 : f32 to vector<16x128xf32>
    %15 = arith.maximumf %13, %14 : vector<16x128xf32>
    %16 = arith.truncf %15 : vector<16x128xf32> to vector<16x128xbf16>
    %c0_12 = arith.constant 0 : index
    %c0_13 = arith.constant 0 : index
    %17 = vector.load %arg6[%c0_12, %c0_13] : memref<128x128xbf16, #tpu.memory_space<vmem>>, vector<128x128xbf16>
    %cst_14 = arith.constant dense<0.000000e+00> : vector<16x128xf32>
    %18 = tpu.matmul %16, %17, %cst_14 {dimension_numbers = #tpu.dot_dimension_numbers<[1], [0], [0], [1], [0, 0, 1, 1], [], []>} : vector<16x128xbf16>, vector<128x128xbf16>, vector<16x128xf32> -> vector<16x128xf32>
    %c0_15 = arith.constant 0 : index
    %c0_16 = arith.constant 0 : index
    %19 = vector.load %arg7[%c0_15, %c0_16] : memref<1x128xf32, #tpu.memory_space<vmem>>, vector<1x128xf32>
    %20 = vector.broadcast %19 : vector<1x128xf32> to vector<16x128xf32>
    %21 = arith.addf %18, %20 : vector<16x128xf32>
    %cst_17 = arith.constant 0.000000e+00 : f32
    %22 = vector.broadcast %cst_17 : f32 to vector<16x128xf32>
    %23 = arith.maximumf %21, %22 : vector<16x128xf32>
    %24 = arith.truncf %23 : vector<16x128xf32> to vector<16x128xbf16>
    %c0_18 = arith.constant 0 : index
    %c0_19 = arith.constant 0 : index
    %25 = vector.load %arg8[%c0_18, %c0_19] : memref<128x128xbf16, #tpu.memory_space<vmem>>, vector<128x128xbf16>
    %cst_20 = arith.constant dense<0.000000e+00> : vector<16x128xf32>
    %26 = tpu.matmul %24, %25, %cst_20 {dimension_numbers = #tpu.dot_dimension_numbers<[1], [0], [0], [1], [0, 0, 1, 1], [], []>} : vector<16x128xbf16>, vector<128x128xbf16>, vector<16x128xf32> -> vector<16x128xf32>
    %c0_21 = arith.constant 0 : index
    %c0_22 = arith.constant 0 : index
    %27 = vector.load %arg9[%c0_21, %c0_22] : memref<1x128xf32, #tpu.memory_space<vmem>>, vector<1x128xf32>
    %28 = vector.broadcast %27 : vector<1x128xf32> to vector<16x128xf32>
    %29 = arith.addf %26, %28 : vector<16x128xf32>
    %cst_23 = arith.constant 0.000000e+00 : f32
    %30 = vector.broadcast %cst_23 : f32 to vector<16x128xf32>
    %31 = arith.maximumf %29, %30 : vector<16x128xf32>
    %32 = arith.truncf %31 : vector<16x128xf32> to vector<16x128xbf16>
    %c0_24 = arith.constant 0 : index
    %c0_25 = arith.constant 0 : index
    %33 = vector.load %arg10[%c0_24, %c0_25] : memref<128x128xbf16, #tpu.memory_space<vmem>>, vector<128x128xbf16>
    %cst_26 = arith.constant dense<0.000000e+00> : vector<16x128xf32>
    %34 = tpu.matmul %32, %33, %cst_26 {dimension_numbers = #tpu.dot_dimension_numbers<[1], [0], [0], [1], [0, 0, 1, 1], [], []>} : vector<16x128xbf16>, vector<128x128xbf16>, vector<16x128xf32> -> vector<16x128xf32>
    %c0_27 = arith.constant 0 : index
    %c0_28 = arith.constant 0 : index
    %35 = vector.load %arg11[%c0_27, %c0_28] : memref<1x128xf32, #tpu.memory_space<vmem>>, vector<1x128xf32>
    %36 = vector.broadcast %35 : vector<1x128xf32> to vector<16x128xf32>
    %37 = arith.addf %34, %36 : vector<16x128xf32>
    %cst_29 = arith.constant 0.000000e+00 : f32
    %38 = vector.broadcast %cst_29 : f32 to vector<16x128xf32>
    %39 = arith.maximumf %37, %38 : vector<16x128xf32>
    %40 = arith.truncf %39 : vector<16x128xf32> to vector<16x128xbf16>
    %c0_30 = arith.constant 0 : index
    %c0_31 = arith.constant 0 : index
    %41 = vector.load %arg12[%c0_30, %c0_31] : memref<128x784xbf16, #tpu.memory_space<vmem>>, vector<128x784xbf16>
    %cst_32 = arith.constant dense<0.000000e+00> : vector<16x784xf32>
    %42 = tpu.matmul %40, %41, %cst_32 {dimension_numbers = #tpu.dot_dimension_numbers<[1], [0], [0], [1], [0, 0, 1, 1], [], []>} : vector<16x128xbf16>, vector<128x784xbf16>, vector<16x784xf32> -> vector<16x784xf32>
    %c0_33 = arith.constant 0 : index
    %c0_34 = arith.constant 0 : index
    %43 = vector.load %arg13[%c0_33, %c0_34] : memref<1x784xf32, #tpu.memory_space<vmem>>, vector<1x784xf32>
    %44 = vector.broadcast %43 : vector<1x784xf32> to vector<16x784xf32>
    %45 = arith.addf %42, %44 : vector<16x784xf32>
    %46 = arith.negf %45 : vector<16x784xf32>
    %47 = math.exp %46 : vector<16x784xf32>
    %cst_35 = arith.constant 1.000000e+00 : f32
    %48 = vector.broadcast %cst_35 : f32 to vector<16x784xf32>
    %49 = arith.addf %48, %47 : vector<16x784xf32>
    %50 = arith.divf %48, %49 : vector<16x784xf32>
    %c0_36 = arith.constant 0 : index
    %c0_37 = arith.constant 0 : index
    %51 = vector.load %arg14[%c0_36, %c0_37] : memref<16x784xf32, #tpu.memory_space<vmem>>, vector<16x784xf32>
    tpu.vector_store %arg14[%c0_36, %c0_37], %50 {strides = array<i32>} : memref<16x784xf32, #tpu.memory_space<vmem>>, vector<16x784xf32>,
    return
  }
  func.func @transform_0(%arg0: i32) -> (i32, i32) {
    %c0_i32 = arith.constant 0 : i32
    %c0_i32_0 = arith.constant 0 : i32
    return %arg0, %c0_i32 : i32, i32
  }
  func.func @transform_1(%arg0: i32) -> (i32, i32) {
    %c0_i32 = arith.constant 0 : i32
    %c0_i32_0 = arith.constant 0 : i32
    %c0_i32_1 = arith.constant 0 : i32
    return %c0_i32, %c0_i32_0 : i32, i32
  }
  func.func @transform_2(%arg0: i32) -> (i32, i32) {
    %c0_i32 = arith.constant 0 : i32
    %c0_i32_0 = arith.constant 0 : i32
    %c0_i32_1 = arith.constant 0 : i32
    return %c0_i32, %c0_i32_0 : i32, i32
  }
  func.func @transform_3(%arg0: i32) -> (i32, i32) {
    %c0_i32 = arith.constant 0 : i32
    %c0_i32_0 = arith.constant 0 : i32
    %c0_i32_1 = arith.constant 0 : i32
    return %c0_i32, %c0_i32_0 : i32, i32
  }
  func.func @transform_4(%arg0: i32) -> (i32, i32) {
    %c0_i32 = arith.constant 0 : i32
    %c0_i32_0 = arith.constant 0 : i32
    %c0_i32_1 = arith.constant 0 : i32
    return %c0_i32, %c0_i32_0 : i32, i32
  }
  func.func @transform_5(%arg0: i32) -> (i32, i32) {
    %c0_i32 = arith.constant 0 : i32
    %c0_i32_0 = arith.constant 0 : i32
    %c0_i32_1 = arith.constant 0 : i32
    return %c0_i32, %c0_i32_0 : i32, i32
  }
  func.func @transform_6(%arg0: i32) -> (i32, i32) {
    %c0_i32 = arith.constant 0 : i32
    %c0_i32_0 = arith.constant 0 : i32
    %c0_i32_1 = arith.constant 0 : i32
    return %c0_i32, %c0_i32_0 : i32, i32
  }
  func.func @transform_7(%arg0: i32) -> (i32, i32) {
    %c0_i32 = arith.constant 0 : i32
    %c0_i32_0 = arith.constant 0 : i32
    %c0_i32_1 = arith.constant 0 : i32
    return %c0_i32, %c0_i32_0 : i32, i32
  }
  func.func @transform_8(%arg0: i32) -> (i32, i32) {
    %c0_i32 = arith.constant 0 : i32
    %c0_i32_0 = arith.constant 0 : i32
    %c0_i32_1 = arith.constant 0 : i32
    return %c0_i32, %c0_i32_0 : i32, i32
  }
  func.func @transform_9(%arg0: i32) -> (i32, i32) {
    %c0_i32 = arith.constant 0 : i32
    %c0_i32_0 = arith.constant 0 : i32
    %c0_i32_1 = arith.constant 0 : i32
    return %c0_i32, %c0_i32_0 : i32, i32
  }
  func.func @transform_10(%arg0: i32) -> (i32, i32) {
    %c0_i32 = arith.constant 0 : i32
    %c0_i32_0 = arith.constant 0 : i32
    %c0_i32_1 = arith.constant 0 : i32
    return %c0_i32, %c0_i32_0 : i32, i32
  }
  func.func @transform_11(%arg0: i32) -> (i32, i32) {
    %c0_i32 = arith.constant 0 : i32
    %c0_i32_0 = arith.constant 0 : i32
    %c0_i32_1 = arith.constant 0 : i32
    return %c0_i32, %c0_i32_0 : i32, i32
  }
  func.func @transform_12(%arg0: i32) -> (i32, i32) {
    %c0_i32 = arith.constant 0 : i32
    %c0_i32_0 = arith.constant 0 : i32
    %c0_i32_1 = arith.constant 0 : i32
    return %c0_i32, %c0_i32_0 : i32, i32
  }
  func.func @transform_13(%arg0: i32) -> (i32, i32) {
    %c0_i32 = arith.constant 0 : i32
    %c0_i32_0 = arith.constant 0 : i32
    return %arg0, %c0_i32 : i32, i32
  }
}

</mosaic_0001>

<bundles_post_ra>
// kernel: tpu_custom_call.1
= control target key start
LH: loop header
LB: loop body
LE: loop exit
PB: predicated region body
PF: predicated region fallthrough
CT: control target
= control target key end

     0   :  { %v2432_v38 = vmov 0.0   ;;  %vm2433_vm0 = vmmov 0   ;;  %vm488_vm1 = vcmask 130048   ;;  %s3044_s0 = inlined_call_operand.vmem [shape: bf16[16,784], index: 0, kind: input, shape index: {}]   ;;  %s3045_s1 = inlined_call_operand.vmem [shape: bf16[784,128], index: 1, kind: input, shape index: {}]   ;;  %s3046_s2 = inlined_call_operand.vmem [shape: f32[1,128], index: 2, kind: input, shape index: {}]   ;;  %s3047_s3 = inlined_call_operand.vmem [shape: bf16[128,128], index: 3, kind: input, shape index: {}]   ;;  %s3048_s4 = inlined_call_operand.vmem [shape: f32[1,128], index: 4, kind: input, shape index: {}]   ;;  %s3049_s5 = inlined_call_operand.vmem [shape: bf16[128,128], index: 5, kind: input, shape index: {}]   ;;  %s3050_s6 = inlined_call_operand.vmem [shape: f32[1,128], index: 6, kind: input, shape index: {}]   ;;  %s3051_s7 = inlined_call_operand.vmem [shape: bf16[128,128], index: 7, kind: input, shape index: {}]   ;;  %s3052_s8 = inlined_call_operand.vmem [shape: f32[1,128], index: 8, kind: input, shape index: {}]   ;;  %s3053_s9 = inlined_call_operand.vmem [shape: bf16[128,128], index: 9, kind: input, shape index: {}]   ;;  %s3054_s10 = inlined_call_operand.vmem [shape: f32[1,128], index: 10, kind: input, shape index: {}]   ;;  %s3055_s11 = inlined_call_operand.vmem [shape: bf16[128,784], index: 11, kind: input, shape index: {}]   ;;  %s3056_s12 = inlined_call_operand.vmem [shape: f32[1,784], index: 12, kind: input, shape index: {}]   ;;  %s3057_s13 = inlined_call_operand.hbm [shape: f32[16,784], index: 13, kind: output, shape index: {}]  }
   0x1   :  { %v2181_v0 = vld [vmem:[%s3045_s1 + $0x40] sm:$0xff]   ;;  %v2185_v4 = vld [vmem:[%s3045_s1 + $0x48] sm:$0xff]   ;;  %v2189_v8 = vld [vmem:[%s3045_s1 + $0x50] sm:$0xff]  }
   0x2   :  { %v2182_v1 = vld [vmem:[%s3045_s1] sm:$0xff]   ;;  %1956 = vmatprep.subr.bf16.mxu0 %v2181_v0  ;;  %v2186_v5 = vld [vmem:[%s3045_s1 + $0x8] sm:$0xff]   ;;  %v2190_v9 = vld [vmem:[%s3045_s1 + $0x10] sm:$0xff]  }
   0x3   :  { %v2183_v2 = vld [vmem:[%s3045_s1 + $0xc0] sm:$0xff]   ;;  %1957 = vmatpush3.bf16.msra.mxu0 %v2182_v1  ;;  %v2187_v6 = vld [vmem:[%s3045_s1 + $0xc8] sm:$0xff]   ;;  %v2191_v10 = vld [vmem:[%s3045_s1 + $0xd0] sm:$0xff]  }
   0x4   :  { %v2184_v3 = vld [vmem:[%s3045_s1 + $0x80] sm:$0xff]   ;;  %1978 = vmatprep.subr.bf16.mxu1 %v2183_v2  ;;  %1958 = vmatprep.subr.bf16.mxu0 %v2185_v4  ;;  %v2188_v7 = vld [vmem:[%s3045_s1 + $0x88] sm:$0xff]   ;;  %v2192_v11 = vld [vmem:[%s3045_s1 + $0x90] sm:$0xff]  }
   0x5   :  { %1979 = vmatpush3.bf16.msra.mxu1 %v2184_v3  ;;  %v2193_v12 = vld [vmem:[%s3045_s1 + $0x58] sm:$0xff]   ;;  %v2197_v16 = vld [vmem:[%s3045_s1 + $0x60] sm:$0xff]   ;;  %v2201_v20 = vld [vmem:[%s3045_s1 + $0x68] sm:$0xff]  }
   0x6   :  { %1980 = vmatprep.subr.bf16.mxu1 %v2187_v6  ;;  %v2194_v13 = vld [vmem:[%s3045_s1 + $0x18] sm:$0xff]   ;;  %v2198_v17 = vld [vmem:[%s3045_s1 + $0x20] sm:$0xff]   ;;  %v2202_v21 = vld [vmem:[%s3045_s1 + $0x28] sm:$0xff]  }
   0x7   :  { %1959 = vmatpush3.bf16.msra.mxu0 %v2186_v5  ;;  %v2195_v14 = vld [vmem:[%s3045_s1 + $0xd8] sm:$0xff]   ;;  %v2199_v18 = vld [vmem:[%s3045_s1 + $0xe0] sm:$0xff]   ;;  %v2203_v22 = vld [vmem:[%s3045_s1 + $0xe8] sm:$0xff]  }
   0x8   :  { %1960 = vmatprep.subr.bf16.mxu0 %v2189_v8  ;;  %v2196_v15 = vld [vmem:[%s3045_s1 + $0x98] sm:$0xff]   ;;  %v2200_v19 = vld [vmem:[%s3045_s1 + $0xa0] sm:$0xff]   ;;  %v2204_v23 = vld [vmem:[%s3045_s1 + $0xa8] sm:$0xff]  }
   0x9   :  { %1981 = vmatpush3.bf16.msra.mxu1 %v2188_v7  ;;  %v2205_v24 = vld [vmem:[%s3045_s1 + $0x70] sm:$0xff]   ;;  %v2209_v28 = vld [vmem:[%s3045_s1 + $0x78] sm:$0xff]   ;;  %v2214_v32 = vld [vmem:[%s3044_s0 + $0x4] ss:$28 sps:$4 sm:$0xff]  }
   0xa   :  { %1982 = vmatprep.subr.bf16.mxu1 %v2191_v10  ;;  %v2206_v25 = vld [vmem:[%s3045_s1 + $0x30] sm:$0xff]   ;;  %v2210_v29 = vld [vmem:[%s3045_s1 + $0x38] sm:$0xff]   ;;  %524 = vmatprep.mubr.bf16.mxu0 %v2214_v32  ;;  %v2216_v34 = vld [vmem:[%s3045_s1 + $0x140] sm:$0xff]  }
   0xb   :  { %1961 = vmatpush3.bf16.msra.mxu0 %v2190_v9  ;;  %v2207_v26 = vld [vmem:[%s3045_s1 + $0xf0] sm:$0xff]   ;;  %v2211_v30 = vld [vmem:[%s3045_s1 + $0xf8] sm:$0xff]   ;;  %v2217_v35 = vld [vmem:[%s3044_s0 + $0x8] ss:$28 sps:$4 sm:$0xff]  }
   0xc   :  { %1962 = vmatprep.subr.bf16.mxu0 %v2193_v12  ;;  %v2208_v27 = vld [vmem:[%s3045_s1 + $0xb0] sm:$0xff]   ;;  %v2212_v31 = vld [vmem:[%s3044_s0] ss:$28 sps:$4 sm:$0xff]   ;;  %v2219_v36 = vld [vmem:[%s3044_s0 + $0xc] ss:$28 sps:$4 sm:$0xff]  }
   0xd   :  { %1983 = vmatpush3.bf16.msra.mxu1 %v2192_v11  ;;  %v2215_v33 = vld [vmem:[%s3045_s1 + $0xb8] sm:$0xff]   ;;  %v2220_v37 = vld [vmem:[%s3045_s1 + $0x100] sm:$0xff]   ;;  %565 = vmatprep.mubr.bf16.mxu1 %v2219_v36  ;;  %v2221_v39 = vld [vmem:[%s3045_s1 + $0x148] sm:$0xff]  }
   0xe   :  { %1984 = vmatprep.subr.bf16.mxu1 %v2195_v14  ;;  %v2222_v40 = vld [vmem:[%s3045_s1 + $0x108] sm:$0xff]   ;;  %v2223_v41 = vld [vmem:[%s3045_s1 + $0x150] sm:$0xff]   ;;  %v2225_v43 = vld [vmem:[%s3045_s1 + $0x158] sm:$0xff]  }
   0xf   :  { %1963 = vmatpush3.bf16.msra.mxu0 %v2194_v13  ;;  %v2224_v42 = vld [vmem:[%s3045_s1 + $0x110] sm:$0xff]   ;;  %v2226_v44 = vld [vmem:[%s3045_s1 + $0x118] sm:$0xff]   ;;  %v2227_v45 = vld [vmem:[%s3045_s1 + $0x160] sm:$0xff]  }
  0x10   :  { %1964 = vmatprep.subr.bf16.mxu0 %v2197_v16  ;;  %v2228_v46 = vld [vmem:[%s3045_s1 + $0x120] sm:$0xff]   ;;  %v2229_v47 = vld [vmem:[%s3045_s1 + $0x168] sm:$0xff]   ;;  %v2238_v50 = vld [vmem:[%s3044_s0 + $0x14] ss:$28 sps:$4 sm:$0xff]  }
  0x11   :  { %1985 = vmatpush3.bf16.msra.mxu1 %v2196_v15  ;;  %v2235_v48 = vld [vmem:[%s3045_s1 + $0x180] sm:$0xff]   ;;  %v2230_v49 = vld [vmem:[%s3045_s1 + $0x128] sm:$0xff]   ;;  %v2231_v51 = vld [vmem:[%s3045_s1 + $0x170] sm:$0xff]  }
  0x12   :  { %1986 = vmatprep.subr.bf16.mxu1 %v2199_v18  ;;  %v2239_v52 = vld [vmem:[%s3044_s0 + $0x18] ss:$28 sps:$4 sm:$0xff]   ;;  %v2236_v56 = vld [vmem:[%s3044_s0 + $0x10] ss:$28 sps:$4 sm:$0xff]  }
  0x13   :  { %1965 = vmatpush3.bf16.msra.mxu0 %v2198_v17  ;;  %v2232_v53 = vld [vmem:[%s3045_s1 + $0x130] sm:$0xff]   ;;  %v2233_v54 = vld [vmem:[%s3045_s1 + $0x178] sm:$0xff]  }
  0x14   :  { %1966 = vmatprep.subr.bf16.mxu0 %v2201_v20  ;;  %v2234_v55 = vld [vmem:[%s3045_s1 + $0x138] sm:$0xff]  }
  0x15   :  { %1987 = vmatpush3.bf16.msra.mxu1 %v2200_v19 }
  0x16   :  { %1988 = vmatprep.subr.bf16.mxu1 %v2203_v22 }
  0x17   :  { %1967 = vmatpush3.bf16.msra.mxu0 %v2202_v21 }
  0x18   :  { %1968 = vmatprep.subr.bf16.mxu0 %v2205_v24 }
  0x19   :  { %1989 = vmatpush3.bf16.msra.mxu1 %v2204_v23 }
  0x1a   :  { %1990 = vmatprep.subr.bf16.mxu1 %v2207_v26 }
  0x1b   :  { %1969 = vmatpush3.bf16.msra.mxu0 %v2206_v25 }
  0x1c   :  { %1970 = vmatprep.subr.bf16.mxu0 %v2209_v28 }
  0x1d   :  { %1991 = vmatpush3.bf16.msra.mxu1 %v2208_v27 }
  0x1e   :  { %1992 = vmatprep.subr.bf16.mxu1 %v2211_v30 }
  0x1f   :  { %1971 = vmatpush3.bf16.msra.mxu0 %v2210_v29 }
  0x20   :  { %2000 = vmatprep.subr.bf16.mxu0 %v2216_v34 }
  0x21   :  { %1993 = vmatpush3.bf16.msra.mxu1 %v2215_v33 }
  0x22   :  { %525 = vmatmul.mubr.bf16.vlgmr.msra.gmra.mrb[0].mxu0 %v2212_v31  ;;  %2069 = vmatprep.subr.bf16.mxu1 %v2432_v38 }
  0x23   :  { %2001 = vmatpush3.bf16.msra.mxu0 %v2220_v37  ;;  %606 = vmatprep.mubr.bf16.mxu0 %v2238_v50 }
  0x24   :  { %566 = vmatmul.mubr.bf16.vlgmr.msra.gmra.mrb[0].mxu1 %v2217_v35  ;;  %2002 = vmatprep.subr.bf16.mxu0 %v2221_v39 }
  0x25   :  { %2071 = vmatprep.mubr.msk.bf16.mxu1 %vm2433_vm0, %v2432_v38  ;;  %2070 = vmatpush3.bf16.msra.mxu1 %v2235_v48 }
  0x26   :  { %2075 = vmatprep.subr.bf16.mxu1 %v2432_v38 }
  0x27   :  { %2003 = vmatpush3.bf16.msra.mxu0 %v2222_v40 }
  0x28   :  { %2004 = vmatprep.subr.bf16.mxu0 %v2223_v41 }
  0x2b   :  { %2005 = vmatpush3.bf16.msra.mxu0 %v2224_v42 }
  0x2c   :  { %2006 = vmatprep.subr.bf16.mxu0 %v2225_v43  ;;  %2072 = vmatmul.mubr.msk.bf16.vlgmr.msra.gmra.mrb[4].mxu1 %vm488_vm1, %v2239_v52 }
  0x2d   :  { %2091 = vmatprep.mubr.msk.bf16.mxu1 %vm2433_vm0, %v2432_v38 }
  0x2f   :  { %2007 = vmatpush3.bf16.msra.mxu0 %v2226_v44 }
  0x30   :  { %2008 = vmatprep.subr.bf16.mxu0 %v2227_v45 }
  0x33   :  { %2009 = vmatpush3.bf16.msra.mxu0 %v2228_v46 }
  0x34   :  { %2010 = vmatprep.subr.bf16.mxu0 %v2229_v47 }
  0x37   :  { %2011 = vmatpush3.bf16.msra.mxu0 %v2230_v49 }
  0x38   :  { %2012 = vmatprep.subr.bf16.mxu0 %v2231_v51 }
  0x3b   :  { %2013 = vmatpush3.bf16.msra.mxu0 %v2232_v53 }
  0x3c   :  { %2014 = vmatprep.subr.bf16.mxu0 %v2233_v54 }
  0x3f   :  { %2015 = vmatpush3.bf16.msra.mxu0 %v2234_v55 }
  0x40   :  { %2095 = vmatprep.subr.bf16.mxu0 %v2432_v38 }
  0x42   :  { %607 = vmatmul.mubr.bf16.vlgmr.msra.gmra.mrb[4].mxu0 %v2236_v56 }
  0x43   :  { %2111 = vmatprep.mubr.msk.bf16.mxu0 %vm2433_vm0, %v2432_v38 }
  0x44   :  { %18 = vsyncpa [#allocation3], 0  ;;  %v2240_v57 = vld [vmem:[%s3047_s3] sm:$0xff]   ;;  %v2241_v58 = vld [vmem:[%s3047_s3 + $0x8] sm:$0xff]  }
  0x45   :  { %2076 = vmatpush3.bf16.msra.mxu1 %v2240_v57  ;;  %v2242_v59 = vld [vmem:[%s3047_s3 + $0x10] sm:$0xff]   ;;  %v2243_v60 = vld [vmem:[%s3047_s3 + $0x18] sm:$0xff]   ;;  %v2244_v61 = vld [vmem:[%s3047_s3 + $0x20] sm:$0xff]  }
  0x46   :  { %2077 = vmatprep.subr.bf16.mxu1 %v2432_v38  ;;  %v2245_v62 = vld [vmem:[%s3047_s3 + $0x28] sm:$0xff]   ;;  %v2246_v63 = vld [vmem:[%s3047_s3 + $0x30] sm:$0xff]   ;;  %v2247_v0 = vld [vmem:[%s3047_s3 + $0x38] sm:$0xff]  }
  0x47   :  { %v2248_v1 = vld [vmem:[%s3049_s5] sm:$0xff]   ;;  %v2249_v2 = vld [vmem:[%s3049_s5 + $0x8] sm:$0xff]   ;;  %v2250_v3 = vld [vmem:[%s3049_s5 + $0x10] sm:$0xff]  }
  0x48   :  { %2096 = vmatpush3.bf16.msra.mxu0 %v2248_v1  ;;  %v2251_v4 = vld [vmem:[%s3049_s5 + $0x18] sm:$0xff]   ;;  %v2252_v5 = vld [vmem:[%s3049_s5 + $0x20] sm:$0xff]   ;;  %v2253_v6 = vld [vmem:[%s3049_s5 + $0x28] sm:$0xff]  }
  0x49   :  { %2078 = vmatpush3.bf16.msra.mxu1 %v2241_v58  ;;  %2097 = vmatprep.subr.bf16.mxu0 %v2432_v38  ;;  %v1792_v8 = vld [vmem:[%s3046_s2] ss:$0 sm:$0xff]  ;;  %v2254_v42 = vld [vmem:[%s3049_s5 + $0x30] sm:$0xff]   ;;  %v2255_v43 = vld [vmem:[%s3049_s5 + $0x38] sm:$0xff]  }
  0x4a   :  { %2079 = vmatprep.subr.bf16.mxu1 %v2432_v38  ;;  %v2256_v44 = vld [vmem:[%s3051_s7] sm:$0xff]   ;;  %v2257_v45 = vld [vmem:[%s3051_s7 + $0x8] sm:$0xff]   ;;  %v2258_v46 = vld [vmem:[%s3051_s7 + $0x10] sm:$0xff]  }
  0x4b   :  { %v2259_v47 = vld [vmem:[%s3051_s7 + $0x18] sm:$0xff]   ;;  %v2260_v48 = vld [vmem:[%s3051_s7 + $0x20] sm:$0xff]   ;;  %v2261_v49 = vld [vmem:[%s3051_s7 + $0x28] sm:$0xff]  }
  0x4c   :  { %2098 = vmatpush3.bf16.msra.mxu0 %v2249_v2  ;;  %v1850_v50 = vld [vmem:[%s3048_s4] ss:$0 sm:$0xff]  ;;  %v2267_v1 = vld [vmem:[%s3053_s9 + $0x18] sm:$0xff]  }
  0x4d   :  { %2080 = vmatpush3.bf16.msra.mxu1 %v2242_v59  ;;  %2099 = vmatprep.subr.bf16.mxu0 %v2432_v38  ;;  %v2268_v2 = vld [vmem:[%s3053_s9 + $0x20] sm:$0xff]  }
  0x4e   :  { %2081 = vmatprep.subr.bf16.mxu1 %v2432_v38 }
  0x50   :  { %2100 = vmatpush3.bf16.msra.mxu0 %v2250_v3  ;;  %v2269_v3 = vld [vmem:[%s3053_s9 + $0x28] sm:$0xff]  }
  0x51   :  { %2082 = vmatpush3.bf16.msra.mxu1 %v2243_v60  ;;  %2101 = vmatprep.subr.bf16.mxu0 %v2432_v38  ;;  %v2262_v60 = vld [vmem:[%s3051_s7 + $0x30] sm:$0xff]  }
  0x52   :  { %2083 = vmatprep.subr.bf16.mxu1 %v2432_v38 }
  0x54   :  { %2102 = vmatpush3.bf16.msra.mxu0 %v2251_v4  ;;  %v1859_v4 = vld [vmem:[%s3050_s6] ss:$0 sm:$0xff] }
  0x55   :  { %2084 = vmatpush3.bf16.msra.mxu1 %v2244_v61  ;;  %2103 = vmatprep.subr.bf16.mxu0 %v2432_v38  ;;  %v2263_v61 = vld [vmem:[%s3051_s7 + $0x38] sm:$0xff]  }
  0x56   :  { %2085 = vmatprep.subr.bf16.mxu1 %v2432_v38 }
  0x58   :  { %2104 = vmatpush3.bf16.msra.mxu0 %v2252_v5 }
  0x59   :  { %2086 = vmatpush3.bf16.msra.mxu1 %v2245_v62  ;;  %2105 = vmatprep.subr.bf16.mxu0 %v2432_v38  ;;  %v2264_v62 = vld [vmem:[%s3053_s9] sm:$0xff]  }
  0x5a   :  { %2087 = vmatprep.subr.bf16.mxu1 %v2432_v38 }
  0x5c   :  { %2106 = vmatpush3.bf16.msra.mxu0 %v2253_v6 }
  0x5d   :  { %2088 = vmatpush3.bf16.msra.mxu1 %v2246_v63  ;;  %2107 = vmatprep.subr.bf16.mxu0 %v2432_v38  ;;  %v2265_v63 = vld [vmem:[%s3053_s9 + $0x8] sm:$0xff]  }
  0x5e   :  { %2089 = vmatprep.subr.bf16.mxu1 %v2432_v38 }
  0x60   :  { %2108 = vmatpush3.bf16.msra.mxu0 %v2254_v42  ;;  %v2281_v42 = vld [vmem:[%s3055_s11 + $0x40] ss:$28 sps:$4 sm:$0xff]  }
  0x61   :  { %2090 = vmatpush3.bf16.msra.mxu1 %v2247_v0  ;;  %2109 = vmatprep.subr.bf16.mxu0 %v2432_v38  ;;  %v2266_v0 = vld [vmem:[%s3053_s9 + $0x10] sm:$0xff]  }
  0x62   :  { %2115 = vmatprep.subr.bf16.mxu1 %v2432_v38 }
  0x64   :  { %2110 = vmatpush3.bf16.msra.mxu0 %v2255_v43  ;;  %v2289_v43 = vld [vmem:[%s3055_s11 + $0x7c] ss:$28 sps:$4 sm:$0xff]  }
  0x65   :  { %2135 = vmatprep.subr.bf16.mxu0 %v2432_v38 }
  0xf5   :  { %v1972_v7 = vpop.f32.mrb[0].mxu0 }
  0xf6   :  { %v1973_v9 = vpop.f32.mrb[1].mxu0 }
  0xf7   :  { %v1974_v10 = vadd.f32 %v1973_v9, %v1972_v7  ;;  %v1975_v11 = vpop.f32.mrb[2].mxu0  ;;  %v1994_v12 = vpop.f32.mrb[0].mxu1 }
  0xf8   :  { %v1976_v13 = vpop.f32.mrb[3].mxu0  ;;  %v1995_v16 = vpop.f32.mrb[1].mxu1 }
  0xf9   :  { %v527_v14 = vadd.f32 %v1974_v10, %v1792_v8  ;;  %v1977_v15 = vadd.f32 %v1976_v13, %v1975_v11  ;;  %v1996_v17 = vadd.f32 %v1995_v16, %v1994_v12  ;;  %v1997_v18 = vpop.f32.mrb[2].mxu1  ;;  %v2272_v16 = vld [vmem:[%s3055_s11] ss:$28 sps:$4 sm:$0xff]  }
  0xfa   :  { %v1998_v20 = vpop.f32.mrb[3].mxu1 }
  0xfb   :  { %v530_v19 = vadd.f32 %v1977_v15, %v1792_v8  ;;  %v568_v21 = vadd.f32 %v1996_v17, %v527_v14  ;;  %v1999_v22 = vadd.f32 %v1998_v20, %v1997_v18  ;;  %v2270_v14 = vld [vmem:[%s3053_s9 + $0x30] sm:$0xff]   ;;  %v2271_v15 = vld [vmem:[%s3053_s9 + $0x38] sm:$0xff]   ;;  %v2274_v17 = vld [vmem:[%s3055_s11 + $0x4] ss:$28 sps:$4 sm:$0xff]  }
  0xfc   :  { %v2277_v18 = vld [vmem:[%s3055_s11 + $0xc] ss:$28 sps:$4 sm:$0xff]   ;;  %v2278_v20 = vld [vmem:[%s3055_s11 + $0x38] ss:$28 sps:$4 sm:$0xff]  }
  0xfd   :  { %v571_v23 = vadd.f32 %v1999_v22, %v530_v19  ;;  %v2280_v19 = vld [vmem:[%s3055_s11 + $0x3c] ss:$28 sps:$4 sm:$0xff]   ;;  %v2284_v22 = vld [vmem:[%s3055_s11 + $0x70] ss:$28 sps:$4 sm:$0xff]  }
  0xff   :  { %v649_v24 = vpop.f32.mrb[4].mxu1 }
 0x100   :  { %v2073_v25 = vpop.f32.mrb[5].mxu1 }
 0x101   :  { %v652_v26 = vpop.f32.mrb[6].mxu1  ;;  %v2298_v25 = vld [vmem:[%s3055_s11 + $0xe4] ss:$28 sps:$4 sm:$0xff]  }
 0x102   :  { %v2074_v27 = vpop.f32.mrb[7].mxu1 }
 0x103   :  { %v2304_v27 = vld [vmem:[%s3055_s11 + $0x11c] ss:$28 sps:$4 sm:$0xff]  }
 0x115   :  { %v2016_v28 = vpop.f32.mrb[4].mxu0 }
 0x116   :  { %v2017_v29 = vpop.f32.mrb[5].mxu0 }
 0x117   :  { %v2018_v30 = vadd.f32 %v2017_v29, %v2016_v28  ;;  %v2019_v31 = vpop.f32.mrb[6].mxu0  ;;  %v2302_v28 = vld [vmem:[%s3055_s11 + $0x118] ss:$28 sps:$4 sm:$0xff]   ;;  %v1868_v29 = vld [vmem:[%s3052_s8] ss:$0 sm:$0xff] }
 0x118   :  { %v2020_v32 = vpop.f32.mrb[7].mxu0 }
 0x119   :  { %v609_v33 = vadd.f32 %v2018_v30, %v568_v21  ;;  %v2021_v34 = vadd.f32 %v2020_v32, %v2019_v31  ;;  %v2286_v21 = vld [vmem:[%s3055_s11 + $0x74] ss:$28 sps:$4 sm:$0xff]  }
 0x11b   :  { %v650_v35 = vadd.f32 %v649_v24, %v609_v33  ;;  %v612_v36 = vadd.f32 %v2021_v34, %v571_v23  ;;  %v2292_v23 = vld [vmem:[%s3055_s11 + $0xac] ss:$28 sps:$4 sm:$0xff]  }
 0x11c   :  { %v2290_v24 = vld [vmem:[%s3055_s11 + $0xa8] ss:$28 sps:$4 sm:$0xff]  }
 0x11d   :  { %v653_v37 = vadd.f32 %v652_v26, %v612_v36  ;;  %v656_v39 = vmax.f32 %v650_v35, 0.0  ;;  %v2296_v26 = vld [vmem:[%s3055_s11 + $0xe0] ss:$28 sps:$4 sm:$0xff]  }
 0x11f   :  { %v657_v40 = vmax.f32 %v653_v37, 0.0 }
 0x121   :  { %v658_v41 = vpack.c.bf16 %v657_v40, %v656_v39  ;;  %v2275_v39 = vld [vmem:[%s3055_s11 + $0x8] ss:$28 sps:$4 sm:$0xff]  }
 0x123   :  { %2092 = vmatmul.mubr.bf16.vlgmr.msra.gmra.mrb[8].mxu1 %v658_v41  ;;  %v2283_v41 = vld [vmem:[%s3055_s11 + $0x44] ss:$28 sps:$4 sm:$0xff]  }
 0x124   :  { %2131 = vmatprep.mubr.msk.bf16.mxu1 %vm2433_vm0, %v2432_v38  ;;  %2116 = vmatpush3.bf16.msra.mxu1 %v2256_v44  ;;  %v2287_v44 = vld [vmem:[%s3055_s11 + $0x78] ss:$28 sps:$4 sm:$0xff]  }
 0x125   :  { %2117 = vmatprep.subr.bf16.mxu1 %v2432_v38 }
 0x128   :  { %2118 = vmatpush3.bf16.msra.mxu1 %v2257_v45  ;;  %v2295_v45 = vld [vmem:[%s3055_s11 + $0xb4] ss:$28 sps:$4 sm:$0xff]  }
 0x129   :  { %2119 = vmatprep.subr.bf16.mxu1 %v2432_v38 }
 0x12c   :  { %2120 = vmatpush3.bf16.msra.mxu1 %v2258_v46  ;;  %v2293_v46 = vld [vmem:[%s3055_s11 + $0xb0] ss:$28 sps:$4 sm:$0xff]  }
 0x12d   :  { %2121 = vmatprep.subr.bf16.mxu1 %v2432_v38 }
 0x130   :  { %2122 = vmatpush3.bf16.msra.mxu1 %v2259_v47  ;;  %v2301_v47 = vld [vmem:[%s3055_s11 + $0xec] ss:$28 sps:$4 sm:$0xff]  }
 0x131   :  { %2123 = vmatprep.subr.bf16.mxu1 %v2432_v38 }
 0x134   :  { %2124 = vmatpush3.bf16.msra.mxu1 %v2260_v48  ;;  %v2299_v48 = vld [vmem:[%s3055_s11 + $0xe8] ss:$28 sps:$4 sm:$0xff]  }
 0x135   :  { %2125 = vmatprep.subr.bf16.mxu1 %v2432_v38 }
 0x138   :  { %2126 = vmatpush3.bf16.msra.mxu1 %v2261_v49  ;;  %v2307_v49 = vld [vmem:[%s3055_s11 + $0x124] ss:$28 sps:$4 sm:$0xff]  }
 0x139   :  { %2127 = vmatprep.subr.bf16.mxu1 %v2432_v38 }
 0x13c   :  { %2128 = vmatpush3.bf16.msra.mxu1 %v2262_v60  ;;  %v2434_v60 = vmov 0  }
 0x13d   :  { %2129 = vmatprep.subr.bf16.mxu1 %v2432_v38 }
 0x140   :  { %2130 = vmatpush3.bf16.msra.mxu1 %v2263_v61  ;;  %v1877_v61 = vld [vmem:[%s3054_s10] ss:$0 sm:$0xff] }
 0x141   :  { %1508 = vmatprep.subr.bf16.mxu1 %v2274_v17  ;;  %v2335_v17 = vld [vmem:[%s3055_s11 + $0xc0] ss:$28 sps:$4 sm:$0xff]  }
 0x1f6   :  { %v764_v51 = vpop.f32.mrb[8].mxu1 }
 0x1f7   :  { %v765_v52 = vadd.f32 %v1850_v50, %v764_v51  ;;  %v2093_v53 = vpop.f32.mrb[9].mxu1  ;;  %v2310_v51 = vld [vmem:[%s3055_s11 + $0x154] ss:$28 sps:$4 sm:$0xff]  }
 0x1f8   :  { %v767_v54 = vpop.f32.mrb[10].mxu1  ;;  %v2308_v53 = vld [vmem:[%s3055_s11 + $0x150] ss:$28 sps:$4 sm:$0xff]  }
 0x1f9   :  { %v768_v55 = vadd.f32 %v1850_v50, %v767_v54  ;;  %v2094_v56 = vpop.f32.mrb[11].mxu1  ;;  %v771_v57 = vmax.f32 %v765_v52, 0.0  ;;  %v2305_v50 = vld [vmem:[%s3055_s11 + $0x120] ss:$28 sps:$4 sm:$0xff]   ;;  %v2311_v54 = vld [vmem:[%s3055_s11 + $0x158] ss:$28 sps:$4 sm:$0xff]  }
 0x1fa   :  { %v2313_v52 = vld [vmem:[%s3055_s11 + $0x15c] ss:$28 sps:$4 sm:$0xff]   ;;  %v2319_v56 = vld [vmem:[%s3055_s11 + $0x194] ss:$28 sps:$4 sm:$0xff]  }
 0x1fb   :  { %v772_v58 = vmax.f32 %v768_v55, 0.0  ;;  %v2316_v55 = vld [vmem:[%s3055_s11 + $0x18c] ss:$28 sps:$4 sm:$0xff]  }
 0x1fd   :  { %v773_v59 = vpack.c.bf16 %v772_v58, %v771_v57  ;;  %v2314_v57 = vld [vmem:[%s3055_s11 + $0x188] ss:$28 sps:$4 sm:$0xff]   ;;  %v2317_v58 = vld [vmem:[%s3055_s11 + $0x190] ss:$28 sps:$4 sm:$0xff]  }
 0x1ff   :  { %2112 = vmatmul.mubr.bf16.vlgmr.msra.gmra.mrb[8].mxu0 %v773_v59  ;;  %v2322_v59 = vld [vmem:[%s3055_s11 + $0x14] ss:$28 sps:$4 sm:$0xff]  }
 0x200   :  { %2151 = vmatprep.mubr.msk.bf16.mxu0 %vm2433_vm0, %v2432_v38  ;;  %2136 = vmatpush3.bf16.msra.mxu0 %v2264_v62 }
 0x201   :  { %2137 = vmatprep.subr.bf16.mxu0 %v2432_v38 }
 0x204   :  { %2138 = vmatpush3.bf16.msra.mxu0 %v2265_v63 }
 0x205   :  { %2139 = vmatprep.subr.bf16.mxu0 %v2432_v38 }
 0x208   :  { %2140 = vmatpush3.bf16.msra.mxu0 %v2266_v0 }
 0x209   :  { %2141 = vmatprep.subr.bf16.mxu0 %v2432_v38 }
 0x20c   :  { %2142 = vmatpush3.bf16.msra.mxu0 %v2267_v1 }
 0x20d   :  { %2143 = vmatprep.subr.bf16.mxu0 %v2432_v38 }
 0x210   :  { %2144 = vmatpush3.bf16.msra.mxu0 %v2268_v2 }
 0x211   :  { %2145 = vmatprep.subr.bf16.mxu0 %v2432_v38 }
 0x214   :  { %2146 = vmatpush3.bf16.msra.mxu0 %v2269_v3 }
 0x215   :  { %2147 = vmatprep.subr.bf16.mxu0 %v2432_v38 }
 0x218   :  { %2148 = vmatpush3.bf16.msra.mxu0 %v2270_v14  ;;  %v2331_v14 = vld [vmem:[%s3055_s11 + $0x88] ss:$28 sps:$4 sm:$0xff]  }
 0x219   :  { %2149 = vmatprep.subr.bf16.mxu0 %v2432_v38 }
 0x21c   :  { %2150 = vmatpush3.bf16.msra.mxu0 %v2271_v15  ;;  %v2334_v15 = vld [vmem:[%s3055_s11 + $0xbc] ss:$28 sps:$4 sm:$0xff]  }
 0x21d   :  { %1551 = vmatprep.subr.bf16.mxu0 %v2277_v18  ;;  %v2338_v18 = vld [vmem:[%s3055_s11 + $0xf4] ss:$28 sps:$4 sm:$0xff]  }
 0x2d2   :  { %v879_v5 = vpop.f32.mrb[8].mxu0 }
 0x2d3   :  { %v880_v6 = vadd.f32 %v1859_v4, %v879_v5  ;;  %v2113_v7 = vpop.f32.mrb[9].mxu0 }
 0x2d4   :  { %v882_v8 = vpop.f32.mrb[10].mxu0  ;;  %v2323_v7 = vld [vmem:[%s3055_s11 + $0x18] ss:$28 sps:$4 sm:$0xff]  }
 0x2d5   :  { %v883_v9 = vadd.f32 %v1859_v4, %v882_v8  ;;  %v2114_v10 = vpop.f32.mrb[11].mxu0  ;;  %v886_v11 = vmax.f32 %v880_v6, 0.0  ;;  %v2320_v6 = vld [vmem:[%s3055_s11 + $0x10] ss:$28 sps:$4 sm:$0xff]  }
 0x2d6   :  { %v2324_v10 = vld [vmem:[%s3055_s11 + $0x48] ss:$28 sps:$4 sm:$0xff]  }
 0x2d7   :  { %v887_v12 = vmax.f32 %v883_v9, 0.0  ;;  %v2326_v9 = vld [vmem:[%s3055_s11 + $0x4c] ss:$28 sps:$4 sm:$0xff]  }
 0x2d9   :  { %v888_v13 = vpack.c.bf16 %v887_v12, %v886_v11  ;;  %v2327_v11 = vld [vmem:[%s3055_s11 + $0x50] ss:$28 sps:$4 sm:$0xff]   ;;  %v2330_v12 = vld [vmem:[%s3055_s11 + $0x84] ss:$28 sps:$4 sm:$0xff]  }
 0x2db   :  { %2132 = vmatmul.mubr.bf16.vlgmr.msra.gmra.mrb[12].mxu1 %v888_v13  ;;  %v2328_v13 = vld [vmem:[%s3055_s11 + $0x80] ss:$28 sps:$4 sm:$0xff]  }
 0x2dc   :  { %1509 = vmatpush1.bf16.msra.mxu1 %v2272_v16  ;;  %1540 = vmatprep.mubr.bf16.mxu1 %v2434_v60  ;;  %v2332_v16 = vld [vmem:[%s3055_s11 + $0xb8] ss:$28 sps:$4 sm:$0xff]  }
 0x2dd   :  { %1510 = vmatprep.subr.bf16.mxu1 %v2280_v19  ;;  %v2336_v19 = vld [vmem:[%s3055_s11 + $0xf0] ss:$28 sps:$4 sm:$0xff]  }
 0x2e0   :  { %1511 = vmatpush1.bf16.msra.mxu1 %v2278_v20  ;;  %v2339_v20 = vld [vmem:[%s3055_s11 + $0xf8] ss:$28 sps:$4 sm:$0xff]  }
 0x2e1   :  { %1512 = vmatprep.subr.bf16.mxu1 %v2286_v21  ;;  %v2342_v21 = vld [vmem:[%s3055_s11 + $0x12c] ss:$28 sps:$4 sm:$0xff]  }
 0x2e4   :  { %1513 = vmatpush1.bf16.msra.mxu1 %v2284_v22  ;;  %v2340_v22 = vld [vmem:[%s3055_s11 + $0x128] ss:$28 sps:$4 sm:$0xff]  }
 0x2e5   :  { %1514 = vmatprep.subr.bf16.mxu1 %v2292_v23  ;;  %v2343_v23 = vld [vmem:[%s3055_s11 + $0x130] ss:$28 sps:$4 sm:$0xff]  }
 0x2e8   :  { %1515 = vmatpush1.bf16.msra.mxu1 %v2290_v24  ;;  %v2346_v24 = vld [vmem:[%s3055_s11 + $0x164] ss:$28 sps:$4 sm:$0xff]  }
 0x2e9   :  { %1516 = vmatprep.subr.bf16.mxu1 %v2298_v25  ;;  %v2344_v25 = vld [vmem:[%s3055_s11 + $0x160] ss:$28 sps:$4 sm:$0xff]  }
 0x2ec   :  { %1517 = vmatpush1.bf16.msra.mxu1 %v2296_v26  ;;  %v2347_v26 = vld [vmem:[%s3055_s11 + $0x168] ss:$28 sps:$4 sm:$0xff]  }
 0x2ed   :  { %1518 = vmatprep.subr.bf16.mxu1 %v2304_v27  ;;  %v2350_v27 = vld [vmem:[%s3055_s11 + $0x19c] ss:$28 sps:$4 sm:$0xff]  }
 0x2f0   :  { %1519 = vmatpush1.bf16.msra.mxu1 %v2302_v28  ;;  %v2348_v28 = vld [vmem:[%s3055_s11 + $0x198] ss:$28 sps:$4 sm:$0xff]  }
 0x2f1   :  { %1520 = vmatprep.subr.bf16.mxu1 %v2310_v51 }
 0x2f4   :  { %1521 = vmatpush1.bf16.msra.mxu1 %v2308_v53 }
 0x2f5   :  { %1522 = vmatprep.subr.bf16.mxu1 %v2316_v55 }
 0x2f8   :  { %1523 = vmatpush1.bf16.msra.mxu1 %v2314_v57 }
 0x2f9   :  { %1594 = vmatprep.subr.bf16.mxu1 %v2322_v59 }
 0x3ae   :  { %v994_v30 = vpop.f32.mrb[12].mxu1 }
 0x3af   :  { %v995_v31 = vadd.f32 %v1868_v29, %v994_v30  ;;  %v2133_v32 = vpop.f32.mrb[13].mxu1  ;;  %v1185_v30 = vlaneseq }
 0x3b0   :  { %v997_v33 = vpop.f32.mrb[14].mxu1 }
 0x3b1   :  { %v998_v34 = vadd.f32 %v1868_v29, %v997_v33  ;;  %v2134_v35 = vpop.f32.mrb[15].mxu1  ;;  %v1001_v36 = vmax.f32 %v995_v31, 0.0  ;;  %v2351_v29 = vld [vmem:[%s3055_s11 + $0x1a0] ss:$28 sps:$4 sm:$0xff]   ;;  %v3009_v31 = vshrl.u32 %v1185_v30, 7  ;;  %s2435_s11 = smov [#allocation2]  }
 0x3b3   :  { %v1002_v37 = vmax.f32 %v998_v34, 0.0  ;;  %v1187_v32 = vsub.s32 0, %v3009_v31  ;;  %v1195_v33 = vsub.s32 2, %v3009_v31  ;;  %v3016_v34 = vld [vmem:[%s3056_s12] sm:$0x7f]  ;;  %v1191_v35 = vsub.s32 1, %v3009_v31 }
 0x3b4   :  { %s1781_s12 = sshll.u32 %s2435_s11, 4  ;;  %s1782_s12 = int_to_ptr.vmem [resolvable:$true] %s1781_s12 }
 0x3b5   :  { %v1003_v40 = vpack.c.bf16 %v1002_v37, %v1001_v36  ;;  %v1188_v36 = vrot.slane %v3016_v34, %v1187_v32  ;;  %v1196_v37 = vrot.slane %v3016_v34, %v1195_v33  ;;  %s2408_s9 = scalar_lea.vmem %s1782_s12, 1792  ;;  %p2413_p1 = scmp.lt.s32.totalorder %s1782_s12, %s1782_s12 }
 0x3b6   :  { %p2409_p0 = scmp.ne.s32.totalorder %s1782_s12, %s2408_s9  ;;  %p2414_p2 = scmp.lt.s32.totalorder %s2408_s9, %s2408_s9 }
 0x3b7   :  { %2152 = vmatmul.mubr.bf16.vlgmr.msra.gmra.mrb[12].mxu0 %v1003_v40 }
 0x3b8   :  { %1552 = vmatpush1.bf16.msra.mxu0 %v2275_v39  ;;  %1583 = vmatprep.mubr.bf16.mxu0 %v2434_v60  ;;  %v1192_v39 = vrot.slane %v3016_v34, %v1191_v35  ;;  %p2415_p3 = por %p2414_p2, %p2413_p1 }
 0x3b9   :  { %1553 = vmatprep.subr.bf16.mxu0 %v2283_v41 }
 0x3ba   :  { %p2416_p4 = pnand %p2415_p3, %p2409_p0 }
 0x3bc   :  { %1554 = vmatpush1.bf16.msra.mxu0 %v2281_v42 }
 0x3bd   :  { %1555 = vmatprep.subr.bf16.mxu0 %v2289_v43 }
 0x3c0   :  { %1556 = vmatpush1.bf16.msra.mxu0 %v2287_v44 }
 0x3c1   :  { %1557 = vmatprep.subr.bf16.mxu0 %v2295_v45 }
 0x3c4   :  { %1558 = vmatpush1.bf16.msra.mxu0 %v2293_v46 }
 0x3c5   :  { %1559 = vmatprep.subr.bf16.mxu0 %v2301_v47 }
 0x3c8   :  { %1560 = vmatpush1.bf16.msra.mxu0 %v2299_v48 }
 0x3c9   :  { %1561 = vmatprep.subr.bf16.mxu0 %v2307_v49 }
 0x3cc   :  { %1562 = vmatpush1.bf16.msra.mxu0 %v2305_v50 }
 0x3cd   :  { %1563 = vmatprep.subr.bf16.mxu0 %v2313_v52 }
 0x3d0   :  { %1564 = vmatpush1.bf16.msra.mxu0 %v2311_v54 }
 0x3d1   :  { %1565 = vmatprep.subr.bf16.mxu0 %v2319_v56 }
 0x3d4   :  { %1566 = vmatpush1.bf16.msra.mxu0 %v2317_v58 }
 0x3d5   :  { %2155 = vmatprep.subr.bf16.mxu0 %v2432_v38 }
 0x48a   :  { %v1109_v62 = vpop.f32.mrb[12].mxu0 }
 0x48b   :  { %v1110_v63 = vadd.f32 %v1877_v61, %v1109_v62  ;;  %v2153_v0 = vpop.f32.mrb[13].mxu0 }
 0x48c   :  { %v1112_v1 = vpop.f32.mrb[14].mxu0 }
 0x48d   :  { %v1113_v2 = vadd.f32 %v1877_v61, %v1112_v1  ;;  %v2154_v3 = vpop.f32.mrb[15].mxu0  ;;  %v1116_v4 = vmax.f32 %v1110_v63, 0.0 }
 0x48f   :  { %v1117_v5 = vmax.f32 %v1113_v2, 0.0 }
 0x491   :  { %v1118_v8 = vpack.c.bf16 %v1117_v5, %v1116_v4 }
 0x493   :  { %1541 = vmatmul.mubr.bf16.vlgmr.msra.gmra.mrb[16].mxu1 %v1118_v8  ;;  %1584 = vmatmul.mubr.bf16.vlgmr.msra.gmra.mrb[16].mxu0 %v1118_v8 }
 0x494   :  { %1595 = vmatpush1.bf16.msra.mxu1 %v2320_v6  ;;  %2156 = vmatpush3.bf16.msra.mxu0 %v2323_v7 }
 0x495   :  { %1596 = vmatprep.subr.bf16.mxu1 %v2326_v9  ;;  %2157 = vmatprep.subr.bf16.mxu0 %v2432_v38 }
 0x496   :  { %1626 = vmatprep.mubr.bf16.mxu1 %v2434_v60  ;;  %2171 = vmatprep.mubr.msk.bf16.mxu0 %vm2433_vm0, %v2432_v38 }
 0x498   :  { %1597 = vmatpush1.bf16.msra.mxu1 %v2324_v10  ;;  %2158 = vmatpush3.bf16.msra.mxu0 %v2327_v11 }
 0x499   :  { %1598 = vmatprep.subr.bf16.mxu1 %v2330_v12  ;;  %2159 = vmatprep.subr.bf16.mxu0 %v2432_v38 }
 0x49c   :  { %1599 = vmatpush1.bf16.msra.mxu1 %v2328_v13  ;;  %2160 = vmatpush3.bf16.msra.mxu0 %v2331_v14 }
 0x49d   :  { %1600 = vmatprep.subr.bf16.mxu1 %v2334_v15  ;;  %2161 = vmatprep.subr.bf16.mxu0 %v2432_v38 }
 0x4a0   :  { %1601 = vmatpush1.bf16.msra.mxu1 %v2332_v16  ;;  %2162 = vmatpush3.bf16.msra.mxu0 %v2335_v17  ;;  %v1203_v17 = vsub.s32 4, %v3009_v31 }
 0x4a1   :  { %1602 = vmatprep.subr.bf16.mxu1 %v2338_v18  ;;  %2163 = vmatprep.subr.bf16.mxu0 %v2432_v38  ;;  %v1211_v18 = vsub.s32 6, %v3009_v31 }
 0x4a4   :  { %1603 = vmatpush1.bf16.msra.mxu1 %v2336_v19  ;;  %2164 = vmatpush3.bf16.msra.mxu0 %v2339_v20  ;;  %v1207_v19 = vsub.s32 5, %v3009_v31 }
 0x4a5   :  { %1604 = vmatprep.subr.bf16.mxu1 %v2342_v21  ;;  %2165 = vmatprep.subr.bf16.mxu0 %v2432_v38 }
 0x4a8   :  { %1605 = vmatpush1.bf16.msra.mxu1 %v2340_v22  ;;  %2166 = vmatpush3.bf16.msra.mxu0 %v2343_v23  ;;  %v1204_v22 = vrot.slane %v3016_v34, %v1203_v17  ;;  %v1212_v23 = vrot.slane %v3016_v34, %v1211_v18 }
 0x4a9   :  { %1606 = vmatprep.subr.bf16.mxu1 %v2346_v24  ;;  %2167 = vmatprep.subr.bf16.mxu0 %v2432_v38 }
 0x4ac   :  { %1607 = vmatpush1.bf16.msra.mxu1 %v2344_v25  ;;  %2168 = vmatpush3.bf16.msra.mxu0 %v2347_v26  ;;  %v1208_v25 = vrot.slane %v3016_v34, %v1207_v19 }
 0x4ad   :  { %1608 = vmatprep.subr.bf16.mxu1 %v2350_v27  ;;  %2169 = vmatprep.subr.bf16.mxu0 %v2432_v38  ;;  %v1199_v38 = vsub.s32 3, %v3009_v31 }
 0x4af   :  { %v1200_v40 = vrot.slane %v3016_v34, %v1199_v38 }
 0x4b0   :  { %1609 = vmatpush1.bf16.msra.mxu1 %v2348_v28  ;;  %2170 = vmatpush3.bf16.msra.mxu0 %v2351_v29 }
 0x4b3   :  { %1627 = vmatmul.mubr.bf16.vlgmr.msra.gmra.mrb[20].mxu1 %v1118_v8  ;;  %2172 = vmatmul.mubr.bf16.vlgmr.msra.gmra.mrb[20].mxu0 %v1118_v8 }
 0x566   :  { %v1542_v41 = vpop.f32.mrb[16].mxu1  ;;  %v1585_v42 = vpop.f32.mrb[16].mxu0 }
 0x567   :  { %v1543_v43 = vadd.f32 %v1542_v41, %v1188_v36  ;;  %v1586_v44 = vadd.f32 %v1585_v42, %v1196_v37  ;;  %v1544_v45 = vpop.f32.mrb[17].mxu1  ;;  %v1587_v46 = vpop.f32.mrb[17].mxu0 }
 0x568   :  { %v1545_v47 = vadd.f32 %v1544_v45, %v1192_v39  ;;  %v1588_v48 = vadd.f32 %v1587_v46, %v1200_v40  ;;  %v1546_v49 = vpop.f32.mrb[18].mxu1  ;;  %v1589_v50 = vpop.f32.mrb[18].mxu0 }
 0x569   :  { %v1942_v51 = vmul.f32 -1.442695, %v1543_v43  ;;  %v1944_v52 = vmul.f32 -1.442695, %v1586_v44  ;;  %v1547_v53 = vadd.f32 %v1546_v49, %v1188_v36  ;;  %v1590_v54 = vadd.f32 %v1589_v50, %v1196_v37  ;;  %v1548_v55 = vpop.f32.mrb[19].mxu1  ;;  %v1591_v56 = vpop.f32.mrb[19].mxu0 }
 0x56a   :  { %v1943_v57 = vmul.f32 -1.442695, %v1545_v47  ;;  %v1945_v58 = vmul.f32 -1.442695, %v1588_v48  ;;  %v1549_v59 = vadd.f32 %v1548_v55, %v1192_v39  ;;  %v1592_v60 = vadd.f32 %v1591_v56, %v1200_v40 }
 0x56b   :  { %2352 = vpow2.f32 %v1942_v51  ;;  %v1949_v61 = vmul.f32 -1.442695, %v1547_v53  ;;  %v1951_v62 = vmul.f32 -1.442695, %v1590_v54 }
 0x56c   :  { %2354 = vpow2.f32 %v1944_v52  ;;  %v1950_v63 = vmul.f32 -1.442695, %v1549_v59  ;;  %v1952_v0 = vmul.f32 -1.442695, %v1592_v60 }
 0x56d   :  { %2356 = vpow2.f32 %v1943_v57 }
 0x56e   :  { %2358 = vpow2.f32 %v1945_v58 }
 0x56f   :  { %2360 = vpow2.f32 %v1949_v61 }
 0x570   :  { %2362 = vpow2.f32 %v1951_v62 }
 0x571   :  { %2364 = vpow2.f32 %v1950_v63 }
 0x572   :  { %2366 = vpow2.f32 %v1952_v0 }
 0x575   :  { %v2353_v1 = vpop.eup %2352 }
 0x576   :  { %v2355_v2 = vpop.eup %2354  ;;  %v1720_v3 = vadd.f32 1.0, %v2353_v1 }
 0x577   :  { %v2357_v4 = vpop.eup %2356  ;;  %v1722_v5 = vadd.f32 1.0, %v2355_v2 }
 0x578   :  { %v2359_v6 = vpop.eup %2358  ;;  %2368 = vrcp.f32 %v1720_v3  ;;  %v1721_v7 = vadd.f32 1.0, %v2357_v4 }
 0x579   :  { %v2361_v8 = vpop.eup %2360  ;;  %2370 = vrcp.f32 %v1722_v5  ;;  %v1723_v9 = vadd.f32 1.0, %v2359_v6 }
 0x57a   :  { %v2363_v10 = vpop.eup %2362  ;;  %2372 = vrcp.f32 %v1721_v7  ;;  %v1727_v11 = vadd.f32 1.0, %v2361_v8 }
 0x57b   :  { %v2365_v12 = vpop.eup %2364  ;;  %2374 = vrcp.f32 %v1723_v9  ;;  %v1729_v13 = vadd.f32 1.0, %v2363_v10 }
 0x57c   :  { %v2367_v14 = vpop.eup %2366  ;;  %2376 = vrcp.f32 %v1727_v11  ;;  %v1728_v15 = vadd.f32 1.0, %v2365_v12 }
 0x57d   :  { %2378 = vrcp.f32 %v1729_v13  ;;  %v1730_v16 = vadd.f32 1.0, %v2367_v14 }
 0x57e   :  { %2380 = vrcp.f32 %v1728_v15 }
 0x57f   :  { %2382 = vrcp.f32 %v1730_v16 }
 0x582   :  { %v2369_v20 = vpop.eup %2368 }
 0x583   :  { %v2371_v21 = vpop.eup %2370  ;;  %1762 = vst [vmem:[#allocation2] sm:$0xff] %v2369_v20 }
 0x584   :  { %v2373_v24 = vpop.eup %2372  ;;  %1764 = vst [vmem:[#allocation2 + $0x10] sm:$0xff] %v2371_v21 }
 0x585   :  { %v2375_v26 = vpop.eup %2374  ;;  %1763 = vst [vmem:[#allocation2 + $0x8] sm:$0xff] %v2373_v24 }
 0x586   :  { %v2377_v27 = vpop.eup %2376  ;;  %1765 = vst [vmem:[#allocation2 + $0x18] sm:$0xff] %v2375_v26  ;;  %v1628_v28 = vpop.f32.mrb[20].mxu1 }
 0x587   :  { %v1671_v29 = vpop.f32.mrb[20].mxu0  ;;  %v2379_v30 = vpop.eup %2378  ;;  %1769 = vst [vmem:[#allocation2 + $0x38] sm:$0xff] %v2377_v27  ;;  %v1629_v31 = vadd.f32 %v1628_v28, %v1204_v22 }
 0x588   :  { %v1672_v32 = vadd.f32 %v1671_v29, %v1212_v23  ;;  %v1630_v33 = vpop.f32.mrb[21].mxu1  ;;  %v2173_v35 = vpop.f32.mrb[21].mxu0  ;;  %1771 = vst [vmem:[#allocation2 + $0x48] sm:$0xff] %v2379_v30 }
 0x589   :  { %v2381_v38 = vpop.eup %2380  ;;  %v1631_v36 = vadd.f32 %v1630_v33, %v1208_v25  ;;  %v1632_v37 = vpop.f32.mrb[22].mxu1  ;;  %v1946_v34 = vmul.f32 -1.442695, %v1629_v31 }
 0x58a   :  { %v1674_v39 = vpop.f32.mrb[22].mxu0  ;;  %v2383_v40 = vpop.eup %2382  ;;  %1770 = vst [vmem:[#allocation2 + $0x40] sm:$0xff] %v2381_v38  ;;  %v1948_v41 = vmul.f32 -1.442695, %v1672_v32  ;;  %v1633_v42 = vadd.f32 %v1632_v37, %v1204_v22 }
 0x58b   :  { %v1675_v43 = vadd.f32 %v1674_v39, %v1212_v23  ;;  %v1634_v44 = vpop.f32.mrb[23].mxu1  ;;  %v2174_v45 = vpop.f32.mrb[23].mxu0  ;;  %1772 = vst [vmem:[#allocation2 + $0x50] sm:$0xff] %v2383_v40  ;;  %v1947_v46 = vmul.f32 -1.442695, %v1631_v36  ;;  %2384 = vpow2.f32 %v1946_v34 }
 0x58c   :  { %v1635_v47 = vadd.f32 %v1634_v44, %v1208_v25  ;;  %v1953_v48 = vmul.f32 -1.442695, %v1633_v42  ;;  %2386 = vpow2.f32 %v1948_v41 }
 0x58d   :  { %v1955_v49 = vmul.f32 -1.442695, %v1675_v43  ;;  %2388 = vpow2.f32 %v1947_v46 }
 0x58e   :  { %v1954_v50 = vmul.f32 -1.442695, %v1635_v47  ;;  %2390 = vpow2.f32 %v1953_v48 }
 0x58f   :  { %2392 = vpow2.f32 %v1955_v49 }
 0x590   :  { %2394 = vpow2.f32 %v1954_v50 }
 0x595   :  { %v2385_v51 = vpop.eup %2384 }
 0x596   :  { %v2387_v52 = vpop.eup %2386  ;;  %v1724_v53 = vadd.f32 1.0, %v2385_v51 }
 0x597   :  { %v2389_v54 = vpop.eup %2388  ;;  %v1726_v55 = vadd.f32 1.0, %v2387_v52 }
 0x598   :  { %v2391_v56 = vpop.eup %2390  ;;  %2396 = vrcp.f32 %v1724_v53  ;;  %v1725_v57 = vadd.f32 1.0, %v2389_v54 }
 0x599   :  { %v2393_v58 = vpop.eup %2392  ;;  %2398 = vrcp.f32 %v1726_v55  ;;  %v1731_v59 = vadd.f32 1.0, %v2391_v56 }
 0x59a   :  { %v2395_v60 = vpop.eup %2394  ;;  %2400 = vrcp.f32 %v1725_v57  ;;  %v1733_v61 = vadd.f32 1.0, %v2393_v58 }
 0x59b   :  { %2402 = vrcp.f32 %v1731_v59  ;;  %v1732_v62 = vadd.f32 1.0, %v2395_v60 }
 0x59c   :  { %2404 = vrcp.f32 %v1733_v61 }
 0x59d   :  { %2406 = vrcp.f32 %v1732_v62 }
 0x5a2   :  { %v2397_v63 = vpop.eup %2396 }
 0x5a3   :  { %v2399_v0 = vpop.eup %2398  ;;  %1766 = vst [vmem:[#allocation2 + $0x20] sm:$0xff] %v2397_v63 }
 0x5a4   :  { %v2401_v1 = vpop.eup %2400  ;;  %1768 = vst.msk [vmem:[#allocation2 + $0x30] sm:$0xff] %vm488_vm1, %v2399_v0 }
 0x5a5   :  { %v2403_v2 = vpop.eup %2402  ;;  %1767 = vst [vmem:[#allocation2 + $0x28] sm:$0xff] %v2401_v1 }
 0x5a6   :  { %v2405_v3 = vpop.eup %2404  ;;  %1773 = vst [vmem:[#allocation2 + $0x58] sm:$0xff] %v2403_v2 }
 0x5a7   :  { %v2407_v4 = vpop.eup %2406  ;;  %1775 = vst.msk [vmem:[#allocation2 + $0x68] sm:$0xff] %vm488_vm1, %v2405_v3 }
 0x5a8   :  { %1774 = vst [vmem:[#allocation2 + $0x60] sm:$0xff] %v2407_v4 }
 0x5a9   :  { %2419 = shalt.err (!%p2416_p4)
}
 0x5aa   :  { %s2420_s27 = scalar_lea.hbm %s3057_s13, 1792 }
 0x5ab   :  { %p2421_p5 = scmp.ne.s32.totalorder %s3057_s13, %s2420_s27  ;;  %p2424_p6 = scmp.lt.u32.totalorder %s2420_s27, %s3057_s13 }
 0x5ad   :  { %p2426_p7 = pnand %p2424_p6, %p2421_p5 }
 0x5af   :  { %2429 = shalt.err (!%p2426_p7)
}
 0x5b0   :  { %s2436_s14 = smov 896   ;;  %s2437_s15 = smov 56  }
 0x5b1   :  { %1787 = dma.vmem_to_hbm [thread:$0]  %s1782_s12, 1792, %s3057_s13, [#allocation3], %s2436_s14, %s2436_s14, %s2437_s15  }
 0x5b2   :  { %2430 = dma.done.wait [#allocation3], 1792  }
 0x5b3   :  { %2431 = vsyncadd [#allocation3], 4294965504 }
 0x5b4   :  { %1791 = vsyncpa [#allocation3], 1 }

</bundles_post_ra>
